<compile_context>
chip_gen: v7x
topology: tpu7x:2x2x1
jax: 0.10.0
libtpu: 0.0.40
codegen_flags: <defaults>
</compile_context>

<pallas_src>
import jax
import jax.numpy as jnp
from jax.experimental import pallas as pl
from jax.experimental.pallas import tpu as pltpu


def fused_conv1x1_epilogue_kernel(x_ref, w_ref, b_ref, o_ref):
    # x_ref: (Cin, T)   w_ref: (Cout, Cin)   b_ref: (Cout, 1)   o_ref: (Cout, T)
    x = x_ref[...]
    w = w_ref[...]
    cin = x.shape[0]

    # v1 = W @ x + b, unrolled as Cin broadcast FMAs on the VPU (Cin is tiny).
    acc = w[:, 0:1] * x[0:1, :]                      # (Cout,1)*(1,T) -> (Cout,T)
    for c in range(1, cin):
        acc = acc + w[:, c:c + 1] * x[c:c + 1, :]
    v1 = acc + b_ref[...]                            # (Cout, T)

    v4 = jnp.maximum(v1 + 3.0, 0.0)                  # relu(v1 + 3)  (no clamp; matches module)
    o_ref[...] = (v1 * v4) * (1.0 / 6.0)


def _pick_tile(hw):
    # Largest lane-dense (multiple-of-128) divisor of HW up to 2048; else full HW
    # (a full-extent last dim is always a legal block dim).
    for t in (2048, 1024, 512, 256, 128):
        if hw % t == 0:
            return t
    return hw


def model_forward(x_nchw, weight, bias):
    """x_nchw: (N, Cin, H, W) f32; weight: (Cout, Cin, 1, 1); bias: (Cout,)."""
    N, Cin, H, W = x_nchw.shape
    Cout = weight.shape[0]
    Ho, Wo = H + 2, W + 2
    HW = H * W
    T = _pick_tile(HW)

    x_flat = x_nchw.reshape(N, Cin, HW)              # free (contiguous) reshape
    w_mat = weight.reshape(Cout, Cin)                # (Cout, Cin)
    b_col = bias.reshape(Cout, 1)                    # (Cout, 1)

    interior_flat = pl.pallas_call(
        fused_conv1x1_epilogue_kernel,
        out_shape=jax.ShapeDtypeStruct((N, Cout, HW), jnp.float32),
        grid=(N, HW // T),
        in_specs=[
            pl.BlockSpec((None, Cin, T), lambda n, j: (n, 0, j)),   # (Cin, T) pixels lane-dense
            pl.BlockSpec((Cout, Cin), lambda n, j: (0, 0)),         # tiny weight tile
            pl.BlockSpec((Cout, 1), lambda n, j: (0, 0)),           # bias column
        ],
        out_specs=pl.BlockSpec((None, Cout, T), lambda n, j: (n, 0, j)),
        compiler_params=pltpu.CompilerParams(
            dimension_semantics=("parallel", "parallel")),
    )(x_flat, w_mat, b_col)

    interior = interior_flat.reshape(N, Cout, H, W)  # free reshape

    # Border pixels see only the bias: out_border = b * relu(b + 3) / 6 per channel.
    border_val = bias * jnp.maximum(bias + 3.0, 0.0) * (1.0 / 6.0)   # (Cout,)
    base = jnp.broadcast_to(border_val.reshape(1, Cout, 1, 1), (N, Cout, Ho, Wo))
    return jax.lax.dynamic_update_slice(base, interior, (0, 0, 1, 1))


def reference_forward(x_nchw, weight, bias):
    """Pure-JAX reference of the PyTorch forward for verification."""
    x_pad = jnp.pad(x_nchw, ((0, 0), (0, 0), (1, 1), (1, 1)))
    v1 = jnp.einsum('nchw,oc->nohw', x_pad, weight.reshape(weight.shape[0], -1))
    v1 = v1 + bias.reshape(1, -1, 1, 1)
    v4 = jnp.maximum(v1 + 3.0, 0.0)
    return v1 * v4 / 6.0


if __name__ == "__main__":
    key = jax.random.PRNGKey(0)
    kx, kw, kb, kx2 = jax.random.split(key, 4)

    Cin, Cout = 3, 8
    bound = 1.0 / (Cin ** 0.5)
    weight = jax.random.uniform(kw, (Cout, Cin, 1, 1), jnp.float32, -bound, bound)
    bias = jax.random.uniform(kb, (Cout,), jnp.float32, -bound, bound)

    # Shape from the module spec: x1 = torch.randn(1, 3, 64, 64)
    x1 = jax.random.normal(kx, (1, Cin, 64, 64), dtype=jnp.float32)
    out1 = model_forward(x1, weight, bias)
    jax.block_until_ready(out1)
    ref1 = reference_forward(x1, weight, bias)
    assert out1.shape == (1, Cout, 66, 66), out1.shape
    assert jnp.allclose(out1, ref1, atol=1e-5, rtol=1e-5), "mismatch vs reference (64x64)"

    # Second, smaller shape exercising batch > 1 and a different tile size.
    x2 = jax.random.normal(kx2, (2, Cin, 16, 16), dtype=jnp.float32)
    out2 = model_forward(x2, weight, bias)
    jax.block_until_ready(out2)
    ref2 = reference_forward(x2, weight, bias)
    assert out2.shape == (2, Cout, 18, 18), out2.shape
    assert jnp.allclose(out2, ref2, atol=1e-5, rtol=1e-5), "mismatch vs reference (16x16)"

    print("KERNEL_OK")
</pallas_src>

<mosaic_0001>
module attributes {stable_mosaic.version = 11 : i64} {
  func.func @fused_conv1x1_epilogue_kernel(%arg0: i32, %arg1: i32, %arg2: memref<1x3x2048xf32, #tpu.memory_space<vmem>>, %arg3: memref<8x3xf32, #tpu.memory_space<vmem>>, %arg4: memref<8x1xf32, #tpu.memory_space<vmem>>, %arg5: memref<1x8x2048xf32, #tpu.memory_space<vmem>>) attributes {dimension_semantics = [#tpu.dimension_semantics<parallel>, #tpu.dimension_semantics<parallel>], iteration_bounds = array<i64: 1, 2>, scalar_prefetch = 0 : i64, scratch_operands = 0 : i64, tpu.core_type = #tpu.core_type<tc>, window_params = [{transform_indices = @transform_0, window_bounds = array<i64: 1, 3, 2048>}, {pipeline_mode = #tpu.pipeline_mode<synchronous>, transform_indices = @transform_1, window_bounds = array<i64: 8, 3>}, {pipeline_mode = #tpu.pipeline_mode<synchronous>, transform_indices = @transform_2, window_bounds = array<i64: 8, 1>}, {transform_indices = @transform_3, window_bounds = array<i64: 1, 8, 2048>}]} {
    %c0 = arith.constant 0 : index
    %c0_0 = arith.constant 0 : index
    %c0_1 = arith.constant 0 : index
    %0 = vector.load %arg2[%c0, %c0_0, %c0_1] : memref<1x3x2048xf32, #tpu.memory_space<vmem>>, vector<1x3x2048xf32>
    %1 = vector.shape_cast %0 : vector<1x3x2048xf32> to vector<3x2048xf32>
    %c0_2 = arith.constant 0 : index
    %c0_3 = arith.constant 0 : index
    %2 = vector.load %arg3[%c0_2, %c0_3] : memref<8x3xf32, #tpu.memory_space<vmem>>, vector<8x3xf32>
    %3 = vector.extract_strided_slice %2 {offsets = [0, 0], sizes = [8, 1], strides = [1, 1]} : vector<8x3xf32> to vector<8x1xf32>
    %4 = vector.extract_strided_slice %1 {offsets = [0, 0], sizes = [1, 2048], strides = [1, 1]} : vector<3x2048xf32> to vector<1x2048xf32>
    %5 = vector.broadcast %3 : vector<8x1xf32> to vector<8x2048xf32>
    %6 = vector.broadcast %4 : vector<1x2048xf32> to vector<8x2048xf32>
    %7 = arith.mulf %5, %6 : vector<8x2048xf32>
    %8 = vector.extract_strided_slice %2 {offsets = [0, 1], sizes = [8, 1], strides = [1, 1]} : vector<8x3xf32> to vector<8x1xf32>
    %9 = vector.extract_strided_slice %1 {offsets = [1, 0], sizes = [1, 2048], strides = [1, 1]} : vector<3x2048xf32> to vector<1x2048xf32>
    %10 = vector.broadcast %8 : vector<8x1xf32> to vector<8x2048xf32>
    %11 = vector.broadcast %9 : vector<1x2048xf32> to vector<8x2048xf32>
    %12 = arith.mulf %10, %11 : vector<8x2048xf32>
    %13 = arith.addf %7, %12 : vector<8x2048xf32>
    %14 = vector.extract_strided_slice %2 {offsets = [0, 2], sizes = [8, 1], strides = [1, 1]} : vector<8x3xf32> to vector<8x1xf32>
    %15 = vector.extract_strided_slice %1 {offsets = [2, 0], sizes = [1, 2048], strides = [1, 1]} : vector<3x2048xf32> to vector<1x2048xf32>
    %16 = vector.broadcast %14 : vector<8x1xf32> to vector<8x2048xf32>
    %17 = vector.broadcast %15 : vector<1x2048xf32> to vector<8x2048xf32>
    %18 = arith.mulf %16, %17 : vector<8x2048xf32>
    %19 = arith.addf %13, %18 : vector<8x2048xf32>
    %c0_4 = arith.constant 0 : index
    %c0_5 = arith.constant 0 : index
    %20 = vector.load %arg4[%c0_4, %c0_5] : memref<8x1xf32, #tpu.memory_space<vmem>>, vector<8x1xf32>
    %21 = vector.broadcast %20 : vector<8x1xf32> to vector<8x2048xf32>
    %22 = arith.addf %19, %21 : vector<8x2048xf32>
    %cst = arith.constant 3.000000e+00 : f32
    %23 = vector.broadcast %cst : f32 to vector<8x2048xf32>
    %24 = arith.addf %22, %23 : vector<8x2048xf32>
    %cst_6 = arith.constant 0.000000e+00 : f32
    %25 = vector.broadcast %cst_6 : f32 to vector<8x2048xf32>
    %26 = arith.maximumf %24, %25 : vector<8x2048xf32>
    %27 = arith.mulf %22, %26 : vector<8x2048xf32>
    %cst_7 = arith.constant 0.166666672 : f32
    %28 = vector.broadcast %cst_7 : f32 to vector<8x2048xf32>
    %29 = arith.mulf %27, %28 : vector<8x2048xf32>
    %c0_8 = arith.constant 0 : index
    %c0_9 = arith.constant 0 : index
    %c0_10 = arith.constant 0 : index
    %30 = vector.load %arg5[%c0_8, %c0_9, %c0_10] : memref<1x8x2048xf32, #tpu.memory_space<vmem>>, vector<1x8x2048xf32>
    %31 = vector.shape_cast %30 : vector<1x8x2048xf32> to vector<8x2048xf32>
    %32 = vector.shape_cast %29 : vector<8x2048xf32> to vector<1x8x2048xf32>
    tpu.vector_store %arg5[%c0_8, %c0_9, %c0_10], %32 {strides = array<i32>} : memref<1x8x2048xf32, #tpu.memory_space<vmem>>, vector<1x8x2048xf32>,
    return
  }
  func.func @transform_0(%arg0: i32, %arg1: i32) -> (i32, i32, i32) {
    %c0_i32 = arith.constant 0 : i32
    %c0_i32_0 = arith.constant 0 : i32
    return %arg0, %c0_i32, %arg1 : i32, i32, i32
  }
  func.func @transform_1(%arg0: i32, %arg1: i32) -> (i32, i32) {
    %c0_i32 = arith.constant 0 : i32
    %c0_i32_0 = arith.constant 0 : i32
    %c0_i32_1 = arith.constant 0 : i32
    return %c0_i32, %c0_i32_0 : i32, i32
  }
  func.func @transform_2(%arg0: i32, %arg1: i32) -> (i32, i32) {
    %c0_i32 = arith.constant 0 : i32
    %c0_i32_0 = arith.constant 0 : i32
    %c0_i32_1 = arith.constant 0 : i32
    return %c0_i32, %c0_i32_0 : i32, i32
  }
  func.func @transform_3(%arg0: i32, %arg1: i32) -> (i32, i32, i32) {
    %c0_i32 = arith.constant 0 : i32
    %c0_i32_0 = arith.constant 0 : i32
    return %arg0, %c0_i32, %arg1 : i32, i32, i32
  }
}

</mosaic_0001>

<bundles_post_ra>
// kernel: tpu_custom_call.1
= control target key start
LH: loop header
LB: loop body
LE: loop exit
PB: predicated region body
PF: predicated region fallthrough
CT: control target
= control target key end

     0   :  { %8 = vsyncpa [#allocation3], 0  ;;  %s1546_s0 = inlined_call_operand.vmem [shape: f32[1,3,4096], index: 0, kind: input, shape index: {}]   ;;  %s1547_s1 = inlined_call_operand.vmem [shape: f32[8,3], index: 1, kind: input, shape index: {}]   ;;  %s1548_s2 = inlined_call_operand.vmem [shape: f32[8,1], index: 2, kind: input, shape index: {}]   ;;  %s1549_s3 = inlined_call_operand.hbm [shape: f32[1,8,4096], index: 3, kind: output, shape index: {}]  }
   0x1   :  { %10 = vsyncpa [#allocation3 + $0x1], 0  ;;  %s1118_s12 = smov 0   ;;  %s1120_s13 = smov 0  }
   0x2   :  { %s1122_s14 = smov 0   ;;  %s1124_s15 = smov 0  }
   0x3   :  { %s1126_s16 = smov 0   ;;  %s1128_s17 = smov 0  }
   0x4 LB: > { %s937_s18 = sadd.s32 4294967295, %s1092_s17   ;;  %s938_s19 = sadd.s32 4294967294, %s1092_s17   ;;  %s1092_s17 = sphi %s1128_s17, %s16_s17   ;;  %s1088_s16 = sphi %s1126_s16, %s1564_s16   ;;  %s1084_s15 = sphi %s1124_s15, %s1563_s15   ;;  %s1080_s14 = sphi %s1122_s14, %s1562_s14   ;;  %s1076_s13 = sphi %s1120_s13, %s1561_s13   ;;  %s1072_s12 = sphi %s1118_s12, %s1560_s12  }
   0x5   : > { %s25_s20 = sadd.s32 1, %s1088_s16  ;;  %s107_s21 = sadd.s32 1, %s1080_s14 }
   0x6   : > { %p26_p0 = scmp.ge.s32.totalorder %s25_s20, 2  ;;  %p117_p1 = scmp.ne.s32.totalorder %s1080_s14, %s1076_s13 }
   0x7   : > { %p118_p2 = scmp.eq.s32.totalorder %s937_s18, 1  ;;  %p123_p3 = scmp.ne.s32.totalorder %s1076_s13, %s1072_s12 }
   0x8   : > { %s1566_s20 = smov (%p26_p0, %s25_s20), 0  ;;  %p124_p5 = scmp.eq.s32.totalorder %s938_s19, 1 }
   0x9   : > { %p1158_p4 = por %p118_p2, %p117_p1  ;;  %s103_s23 = ssub.s32 %s1088_s16, %s1566_s20 }
   0xa   : > { %p941_p6 = scmp.ge.s32.totalorder %s1092_s17, 1  ;;  %p105_p7 = scmp.eq.s32.totalorder %s103_s23, 0 }
   0xb   : > { %p1165_p8 = por %p124_p5, %p123_p3  ;;  %p161_p9 = scmp.lt.s32.totalorder %s1092_s17, 3 }
   0xc   : > { %s1171_s25 = scalar_select %p105_p7, %s1080_s14, %s107_s21  }
   0xd   : > { %p162_p10 = pnand %p941_p6, %p161_p9 }
   0xf   : > { %165 = sbr.rel (%p162_p10) target bundleno = 212 (0xd4), region = 32 }
  0x16   : > { %v208_v0 = vld [vmem:[%s1547_s1] sm:$0xff]  ;;  %v1094_v1 = vmov 0   ;;  %v1095_v2 = vmov 2   ;;  %v1096_v4 = vmov 1   ;;  %s943_s30 = sshll.u32 %s1084_s15, 4  ;;  %v222_v5 = vlaneseq  ;;  %s186_s8 = sand.u32 1, %s1076_s13  }
  0x17   : > { %1009 = vset.pattern.permute.xlu0 %v1094_v1  ;;  %1011 = vset.pattern.permute.xlu1 %v1095_v2  ;;  %v742_v3 = vld [vmem:[%s1548_s2] sm:$0xff]  ;;  %p192_p11 = scmp.lt.s32.totalorder %s943_s30, 31  ;;  %s942_s9 = sshll.u32 %s186_s8, 7 }
  0x18   : > { %211 = vperm.xlu0 %1009, %v208_v0   ;;  %563 = vperm.xlu1 %1011, %v208_v0   ;;  %v1180_v6 = vshrl.u32 %v222_v5, 7  ;;  %s950_s10 = sshll.u32 %s1084_s15, 11  ;;  %s1471_s11 = scalar_lea.vmem [#allocation2], %s942_s9 }
  0x19   : > { %s1568_s30 = smov (!%p192_p11, %s943_s30), 31  ;;  %s861_s18 = sshll.u32 %s1471_s11, 4  ;;  %s1495_s18 = int_to_ptr.vmem [resolvable:$true] %s861_s18 }
  0x1a   : > { %s944_s4 = sshll.u32 %s1568_s30, 2  ;;  %v224_v7 = vsub.s32 0, %v1180_v6  ;;  %v228_v8 = vsub.s32 4, %v1180_v6  ;;  %v1196_v13 = vsub.s32 1, %v1180_v6  ;;  %v1199_v14 = vsub.s32 5, %v1180_v6  ;;  %s1491_s23 = scalar_lea.hbm %s1549_s3, %s950_s10 }
  0x1b   : > { %s197_s7 = scalar_lea.vmem %s1546_s0, %s944_s4  ;;  %v1206_v17 = vsub.s32 2, %v1180_v6  ;;  %s845_s26 = scalar_lea.sflag [#allocation3], %s186_s8 }
  0x1c   : > { %1010 = vset.pattern.permute.xlu0 %v1096_v4  ;;  %1012 = vset.pattern.permute.xlu1 %v1094_v1  ;;  %v1187_v9 = vld [vmem:[%s197_s7] sm:$0x77]  ;;  %v1189_v10 = vld [vmem:[%s197_s7 + $0x8] sm:$0x77]  ;;  %v1191_v11 = vld [vmem:[%s197_s7 + $0x10] sm:$0x77] }
  0x1d   : > { %383 = vperm.xlu0 %1010, %v208_v0   ;;  %745 = vperm.xlu1 %1012, %v742_v3   ;;  %v1193_v12 = vld [vmem:[%s197_s7 + $0x18] sm:$0x77]  ;;  %v1201_v15 = vld [vmem:[%s197_s7 + $0x20] sm:$0x77]  ;;  %v1203_v16 = vld [vmem:[%s197_s7 + $0x28] sm:$0x77]  ;;  %v225_v20 = vrot.slane %v1187_v9, %v224_v7  ;;  %v229_v21 = vrot.slane %v1187_v9, %v228_v8  ;;  %v233_v22 = vrot.slane %v1189_v10, %v224_v7 }
  0x1e   : > { %v1208_v18 = vld [vmem:[%s197_s7 + $0x30] sm:$0x77]  ;;  %v1210_v19 = vld [vmem:[%s197_s7 + $0x38] sm:$0x77]  ;;  %v237_v23 = vrot.slane %v1189_v10, %v228_v8  ;;  %v241_v24 = vrot.slane %v1191_v11, %v224_v7  ;;  %v245_v25 = vrot.slane %v1191_v11, %v228_v8  ;;  %v249_v26 = vrot.slane %v1193_v12, %v224_v7  ;;  %s1014_s27 = scalar_lea.vmem %s1495_s18, 2048  ;;  %s1097_s15 = smov [#allocation2]  }
  0x1f   : > { %v253_v27 = vrot.slane %v1193_v12, %v228_v8  ;;  %v257_v28 = vrot.slane %v1201_v15, %v224_v7  ;;  %v261_v29 = vrot.slane %v1201_v15, %v228_v8  ;;  %v265_v30 = vrot.slane %v1203_v16, %v224_v7  ;;  %p1015_p12 = scmp.ne.s32.totalorder %s1495_s18, %s1014_s27  ;;  %s1018_s28 = sshll.u32 %s1097_s15, 4  ;;  %s1019_s28 = int_to_ptr.vmem [resolvable:$false] %s1018_s28 }
  0x20   : > { %v269_v31 = vrot.slane %v1203_v16, %v228_v8  ;;  %v273_v32 = vrot.slane %v1208_v18, %v224_v7  ;;  %v277_v33 = vrot.slane %v1208_v18, %v228_v8  ;;  %v281_v34 = vrot.slane %v1210_v19, %v224_v7  ;;  %s1020_s29 = scalar_lea.vmem %s1019_s28, 4096  ;;  %p1021_p1 = scmp.lt.s32.totalorder %s1495_s18, %s1019_s28 }
  0x21   : > { %1013 = vset.pattern.permute.xlu0 %v1094_v1  ;;  %v285_v35 = vrot.slane %v1210_v19, %v228_v8  ;;  %v1228_v36 = vrot.slane %v225_v20, %v224_v7  ;;  %v1230_v37 = vrot.slane %v229_v21, %v224_v7  ;;  %v1232_v38 = vrot.slane %v233_v22, %v224_v7  ;;  %p1016_p13 = pnand %p1015_p12, %p1158_p4  ;;  %p1022_p2 = scmp.lt.s32.totalorder %s1020_s29, %s1014_s27 }
  0x22   : > { %v1234_v39 = vrot.slane %v237_v23, %v224_v7  ;;  %v1236_v40 = vrot.slane %v241_v24, %v224_v7  ;;  %v1238_v41 = vrot.slane %v245_v25, %v224_v7  ;;  %v1240_v42 = vrot.slane %v249_v26, %v224_v7 }
  0x23   : > { %v1242_v43 = vrot.slane %v253_v27, %v224_v7  ;;  %v1244_v44 = vrot.slane %v257_v28, %v224_v7  ;;  %v1246_v45 = vrot.slane %v261_v29, %v224_v7  ;;  %v1248_v46 = vrot.slane %v265_v30, %v224_v7  ;;  %p1017_p0 = pneg %p1016_p13  ;;  %p1023_p3 = por %p1022_p2, %p1021_p1 }
  0x24   : > { %v1250_v47 = vrot.slane %v269_v31, %v224_v7  ;;  %v1252_v48 = vrot.slane %v273_v32, %v224_v7  ;;  %v1254_v49 = vrot.slane %v277_v33, %v224_v7  ;;  %v1256_v50 = vrot.slane %v281_v34, %v224_v7 }
  0x25   : > { %v1258_v51 = vrot.slane %v285_v35, %v224_v7  ;;  %v389_v52 = vrot.slane %v1187_v9, %v1196_v13  ;;  %v393_v53 = vrot.slane %v1187_v9, %v1199_v14  ;;  %v397_v54 = vrot.slane %v1189_v10, %v1196_v13  ;;  %p1024_p5 = pnand %p1023_p3, %p1017_p0 }
  0x26   : > { %v401_v55 = vrot.slane %v1189_v10, %v1199_v14  ;;  %v405_v56 = vrot.slane %v1191_v11, %v1196_v13  ;;  %v409_v57 = vrot.slane %v1191_v11, %v1199_v14  ;;  %v413_v58 = vrot.slane %v1193_v12, %v1196_v13 }
  0x27   : > { %v417_v59 = vrot.slane %v1193_v12, %v1199_v14  ;;  %v421_v60 = vrot.slane %v1201_v15, %v1196_v13  ;;  %v425_v61 = vrot.slane %v1201_v15, %v1199_v14  ;;  %v429_v62 = vrot.slane %v1203_v16, %v1196_v13 }
  0x28   : > { %v433_v63 = vrot.slane %v1203_v16, %v1199_v14  ;;  %v437_v0 = vrot.slane %v1208_v18, %v1196_v13  ;;  %v441_v1 = vrot.slane %v1208_v18, %v1199_v14  ;;  %v445_v2 = vrot.slane %v1210_v19, %v1196_v13 }
  0x29   : > { %v449_v3 = vrot.slane %v1210_v19, %v1199_v14  ;;  %v1293_v4 = vrot.slane %v389_v52, %v1196_v13  ;;  %v1296_v5 = vrot.slane %v393_v53, %v1196_v13  ;;  %v572_v7 = vsub.s32 6, %v1180_v6 }
  0x2a   : > { %v1300_v8 = vrot.slane %v397_v54, %v1196_v13  ;;  %v1303_v20 = vrot.slane %v401_v55, %v1196_v13  ;;  %v1306_v21 = vrot.slane %v405_v56, %v1196_v13  ;;  %v1309_v22 = vrot.slane %v409_v57, %v1196_v13 }
  0x2b   : > { %v1312_v14 = vrot.slane %v413_v58, %v1196_v13  ;;  %v1315_v23 = vrot.slane %v417_v59, %v1196_v13  ;;  %v1318_v6 = vrot.slane %v421_v60, %v1196_v13  ;;  %v1321_v24 = vrot.slane %v425_v61, %v1196_v13 }
  0x2c   : > { %v1324_v25 = vrot.slane %v429_v62, %v1196_v13  ;;  %v1327_v26 = vrot.slane %v433_v63, %v1196_v13  ;;  %v1330_v27 = vrot.slane %v437_v0, %v1196_v13  ;;  %v1333_v28 = vrot.slane %v441_v1, %v1196_v13 }
  0x2d   : > { %v1336_v29 = vrot.slane %v445_v2, %v1196_v13  ;;  %v1339_v30 = vrot.slane %v449_v3, %v1196_v13  ;;  %v569_v31 = vrot.slane %v1187_v9, %v1206_v17  ;;  %v573_v32 = vrot.slane %v1187_v9, %v572_v7 }
  0x2e   : > { %v577_v33 = vrot.slane %v1189_v10, %v1206_v17  ;;  %v581_v34 = vrot.slane %v1189_v10, %v572_v7  ;;  %v585_v35 = vrot.slane %v1191_v11, %v1206_v17  ;;  %v589_v52 = vrot.slane %v1191_v11, %v572_v7 }
  0x2f   : > { %v593_v53 = vrot.slane %v1193_v12, %v1206_v17  ;;  %v597_v13 = vrot.slane %v1193_v12, %v572_v7  ;;  %v601_v54 = vrot.slane %v1201_v15, %v1206_v17  ;;  %v605_v9 = vrot.slane %v1201_v15, %v572_v7 }
  0x30   : > { %v609_v55 = vrot.slane %v1203_v16, %v1206_v17  ;;  %v613_v10 = vrot.slane %v1203_v16, %v572_v7  ;;  %v617_v56 = vrot.slane %v1208_v18, %v1206_v17  ;;  %v621_v11 = vrot.slane %v1208_v18, %v572_v7 }
  0x31   : > { %v625_v57 = vrot.slane %v1210_v19, %v1206_v17  ;;  %v629_v12 = vrot.slane %v1210_v19, %v572_v7  ;;  %v649_v58 = vrot.slane %v569_v31, %v1206_v17  ;;  %v653_v59 = vrot.slane %v573_v32, %v1206_v17 }
  0x32   : > { %v657_v15 = vrot.slane %v577_v33, %v1206_v17  ;;  %v661_v60 = vrot.slane %v581_v34, %v1206_v17  ;;  %v1370_v16 = vrot.slane %v585_v35, %v1206_v17  ;;  %v1373_v61 = vrot.slane %v589_v52, %v1206_v17 }
  0x33   : > { %v1376_v18 = vrot.slane %v593_v53, %v1206_v17  ;;  %v1379_v62 = vrot.slane %v597_v13, %v1206_v17  ;;  %v1382_v19 = vrot.slane %v601_v54, %v1206_v17  ;;  %v1385_v63 = vrot.slane %v605_v9, %v1206_v17 }
  0x34   : > { %v1388_v1 = vrot.slane %v609_v55, %v1206_v17  ;;  %v1391_v2 = vrot.slane %v613_v10, %v1206_v17  ;;  %v1394_v3 = vrot.slane %v617_v56, %v1206_v17  ;;  %v1397_v7 = vrot.slane %v621_v11, %v1206_v17 }
  0x35   : > { %v1402_v33 = vrot.slane %v625_v57, %v1206_v17  ;;  %v1405_v34 = vrot.slane %v629_v12, %v1206_v17 }
  0x36   : > { %1552 = vst [vmem:[#allocation5_spill] sm:$0xff] %v1394_v3  ;;  %1553 = vst [vmem:[#allocation6_spill] sm:$0xff] %v1397_v7 }
  0x37   : > { %1554 = vst [vmem:[#allocation7_spill] sm:$0xff] %v1402_v33  ;;  %1555 = vst [vmem:[#allocation8_spill] sm:$0xff] %v1405_v34 }
  0x97   : > { %v212_v0 = vpop.permute.xlu0 %211  ;;  %v1411_v54 = vpop.permute.xlu1 %563 }
  0x98   : > { %v366_v31 = vmul.f32 %v1228_v36, %v212_v0  ;;  %v367_v32 = vmul.f32 %v1230_v37, %v212_v0  ;;  %v368_v35 = vmul.f32 %v1232_v38, %v212_v0  ;;  %v369_v52 = vmul.f32 %v1234_v39, %v212_v0 }
  0x99   : > { %v370_v53 = vmul.f32 %v1236_v40, %v212_v0  ;;  %v371_v13 = vmul.f32 %v1238_v41, %v212_v0  ;;  %v372_v36 = vmul.f32 %v1240_v42, %v212_v0  ;;  %v373_v37 = vmul.f32 %v1242_v43, %v212_v0 }
  0x9a   : > { %v374_v9 = vmul.f32 %v1244_v44, %v212_v0  ;;  %v375_v55 = vmul.f32 %v1246_v45, %v212_v0  ;;  %v376_v17 = vmul.f32 %v1248_v46, %v212_v0  ;;  %v377_v38 = vmul.f32 %v1250_v47, %v212_v0 }
  0x9b   : > { %v378_v39 = vmul.f32 %v1252_v48, %v212_v0  ;;  %v379_v40 = vmul.f32 %v1254_v49, %v212_v0  ;;  %v380_v41 = vmul.f32 %v1256_v50, %v212_v0  ;;  %v381_v56 = vmul.f32 %v1258_v51, %v212_v0 }
  0x9c   : > { %v384_v10 = vpop.permute.xlu0 %383  ;;  %v710_v42 = vmul.f32 %v649_v58, %v1411_v54  ;;  %v711_v43 = vmul.f32 %v653_v59, %v1411_v54  ;;  %v712_v46 = vmul.f32 %v657_v15, %v1411_v54  ;;  %v713_v47 = vmul.f32 %v661_v60, %v1411_v54 }
  0x9d   : > { %v530_v44 = vmul.f32 %v1293_v4, %v384_v10  ;;  %v531_v45 = vmul.f32 %v1296_v5, %v384_v10  ;;  %v532_v48 = vmul.f32 %v1300_v8, %v384_v10  ;;  %v533_v49 = vmul.f32 %v1303_v20, %v384_v10 }
  0x9e   : > { %v534_v50 = vmul.f32 %v1306_v21, %v384_v10  ;;  %v535_v51 = vmul.f32 %v1309_v22, %v384_v10  ;;  %v536_v11 = vmul.f32 %v1312_v14, %v384_v10  ;;  %v537_v57 = vmul.f32 %v1315_v23, %v384_v10 }
  0x9f   : > { %v538_v4 = vmul.f32 %v1318_v6, %v384_v10  ;;  %v539_v5 = vmul.f32 %v1321_v24, %v384_v10  ;;  %v540_v12 = vmul.f32 %v1324_v25, %v384_v10  ;;  %v541_v58 = vmul.f32 %v1327_v26, %v384_v10 }
  0xa0   : > { %v542_v8 = vmul.f32 %v1330_v27, %v384_v10  ;;  %v543_v20 = vmul.f32 %v1333_v28, %v384_v10  ;;  %v544_v21 = vmul.f32 %v1336_v29, %v384_v10  ;;  %v545_v22 = vmul.f32 %v1339_v30, %v384_v10 }
  0xa1   : > { %v546_v59 = vadd.f32 %v530_v44, %v366_v31  ;;  %v547_v14 = vadd.f32 %v531_v45, %v367_v32  ;;  %v548_v15 = vadd.f32 %v532_v48, %v368_v35  ;;  %v549_v23 = vadd.f32 %v533_v49, %v369_v52 }
  0xa2   : > { %v550_v60 = vadd.f32 %v534_v50, %v370_v53  ;;  %v551_v6 = vadd.f32 %v535_v51, %v371_v13  ;;  %v552_v0 = vadd.f32 %v536_v11, %v372_v36  ;;  %v553_v24 = vadd.f32 %v537_v57, %v373_v37 }
  0xa3   : > { %v554_v34 = vadd.f32 %v538_v4, %v374_v9  ;;  %v555_v25 = vadd.f32 %v539_v5, %v375_v55  ;;  %v556_v33 = vadd.f32 %v540_v12, %v376_v17  ;;  %v557_v26 = vadd.f32 %v541_v58, %v377_v38  ;;  %v746_v17 = vpop.permute.xlu1 %745 }
  0xa4   : > { %v558_v7 = vadd.f32 %v542_v8, %v378_v39  ;;  %v559_v27 = vadd.f32 %v543_v20, %v379_v40  ;;  %v560_v3 = vadd.f32 %v544_v21, %v380_v41  ;;  %v561_v28 = vadd.f32 %v545_v22, %v381_v56 }
  0xa5   : > { %v714_v29 = vmul.f32 %v1370_v16, %v1411_v54  ;;  %v715_v30 = vmul.f32 %v1373_v61, %v1411_v54  ;;  %v716_v31 = vmul.f32 %v1376_v18, %v1411_v54  ;;  %v717_v32 = vmul.f32 %v1379_v62, %v1411_v54  ;;  %v1556_v61 = vld [vmem:[#allocation5_spill] sm:$0xff]  ;;  %v1557_v18 = vld [vmem:[#allocation6_spill] sm:$0xff]  ;;  %v1558_v62 = vld [vmem:[#allocation7_spill] sm:$0xff] }
  0xa6   : > { %v718_v35 = vmul.f32 %v1382_v19, %v1411_v54  ;;  %v719_v52 = vmul.f32 %v1385_v63, %v1411_v54  ;;  %v720_v53 = vmul.f32 %v1388_v1, %v1411_v54  ;;  %v721_v16 = vmul.f32 %v1391_v2, %v1411_v54  ;;  %v1559_v63 = vld [vmem:[#allocation8_spill] sm:$0xff] }
  0xa7   : > { %v722_v13 = vmul.f32 %v1556_v61, %v1411_v54  ;;  %v723_v36 = vmul.f32 %v1557_v18, %v1411_v54  ;;  %v724_v37 = vmul.f32 %v1558_v62, %v1411_v54  ;;  %v726_v9 = vadd.f32 %v710_v42, %v546_v59 }
  0xa8   : > { %v727_v19 = vadd.f32 %v711_v43, %v547_v14  ;;  %v728_v55 = vadd.f32 %v712_v46, %v548_v15  ;;  %v725_v38 = vmul.f32 %v1559_v63, %v1411_v54  ;;  %v729_v1 = vadd.f32 %v713_v47, %v549_v23 }
  0xa9   : > { %v730_v39 = vadd.f32 %v714_v29, %v550_v60  ;;  %v731_v40 = vadd.f32 %v715_v30, %v551_v6  ;;  %v732_v2 = vadd.f32 %v716_v31, %v552_v0  ;;  %v733_v10 = vadd.f32 %v717_v32, %v553_v24 }
  0xaa   : > { %v734_v41 = vadd.f32 %v718_v35, %v554_v34  ;;  %v735_v56 = vadd.f32 %v719_v52, %v555_v25  ;;  %v736_v44 = vadd.f32 %v720_v53, %v556_v33  ;;  %v737_v45 = vadd.f32 %v721_v16, %v557_v26 }
  0xab   : > { %v738_v48 = vadd.f32 %v722_v13, %v558_v7  ;;  %v739_v49 = vadd.f32 %v723_v36, %v559_v27  ;;  %v740_v50 = vadd.f32 %v724_v37, %v560_v3  ;;  %v748_v51 = vadd.f32 %v746_v17, %v726_v9 }
  0xac   : > { %v749_v42 = vadd.f32 %v746_v17, %v727_v19  ;;  %v750_v43 = vadd.f32 %v746_v17, %v728_v55  ;;  %v741_v46 = vadd.f32 %v725_v38, %v561_v28  ;;  %v751_v11 = vadd.f32 %v746_v17, %v729_v1 }
  0xad   : > { %v752_v57 = vadd.f32 %v746_v17, %v730_v39  ;;  %v753_v4 = vadd.f32 %v746_v17, %v731_v40  ;;  %v754_v54 = vadd.f32 %v746_v17, %v732_v2  ;;  %v755_v47 = vadd.f32 %v746_v17, %v733_v10 }
  0xae   : > { %v756_v5 = vadd.f32 %v746_v17, %v734_v41  ;;  %v757_v12 = vadd.f32 %v746_v17, %v735_v56  ;;  %v758_v58 = vadd.f32 %v746_v17, %v736_v44  ;;  %v759_v34 = vadd.f32 %v746_v17, %v737_v45 }
  0xaf   : > { %v760_v8 = vadd.f32 %v746_v17, %v738_v48  ;;  %v761_v33 = vadd.f32 %v746_v17, %v739_v49  ;;  %v762_v20 = vadd.f32 %v746_v17, %v740_v50  ;;  %v764_v7 = vadd.f32 3.0, %v748_v51 }
  0xb0   : > { %v765_v21 = vadd.f32 3.0, %v749_v42  ;;  %v766_v3 = vadd.f32 3.0, %v750_v43  ;;  %v763_v22 = vadd.f32 %v746_v17, %v741_v46  ;;  %v767_v59 = vadd.f32 3.0, %v751_v11 }
  0xb1   : > { %v768_v14 = vadd.f32 3.0, %v752_v57  ;;  %v769_v15 = vadd.f32 3.0, %v753_v4  ;;  %v770_v23 = vadd.f32 3.0, %v754_v54  ;;  %v771_v60 = vadd.f32 3.0, %v755_v47 }
  0xb2   : > { %v772_v6 = vadd.f32 3.0, %v756_v5  ;;  %v773_v0 = vadd.f32 3.0, %v757_v12  ;;  %v774_v24 = vadd.f32 3.0, %v758_v58  ;;  %v775_v25 = vadd.f32 3.0, %v759_v34 }
  0xb3   : > { %v776_v26 = vadd.f32 3.0, %v760_v8  ;;  %v777_v27 = vadd.f32 3.0, %v761_v33  ;;  %v778_v28 = vadd.f32 3.0, %v762_v20  ;;  %v780_v29 = vmax.f32 %v764_v7, 0.0 }
  0xb4   : > { %v781_v30 = vmax.f32 %v765_v21, 0.0  ;;  %v782_v31 = vmax.f32 %v766_v3, 0.0  ;;  %v779_v32 = vadd.f32 3.0, %v763_v22  ;;  %v783_v35 = vmax.f32 %v767_v59, 0.0 }
  0xb5   : > { %v784_v52 = vmax.f32 %v768_v14, 0.0  ;;  %v785_v53 = vmax.f32 %v769_v15, 0.0  ;;  %v786_v16 = vmax.f32 %v770_v23, 0.0  ;;  %v787_v61 = vmax.f32 %v771_v60, 0.0 }
  0xb6   : > { %v788_v13 = vmax.f32 %v772_v6, 0.0  ;;  %v789_v18 = vmax.f32 %v773_v0, 0.0  ;;  %v790_v36 = vmax.f32 %v774_v24, 0.0  ;;  %v791_v62 = vmax.f32 %v775_v25, 0.0 }
  0xb7   : > { %v792_v37 = vmax.f32 %v776_v26, 0.0  ;;  %v793_v9 = vmax.f32 %v777_v27, 0.0  ;;  %v794_v19 = vmax.f32 %v778_v28, 0.0  ;;  %v796_v55 = vmul.f32 %v780_v29, %v748_v51 }
  0xb8   : > { %v797_v17 = vmul.f32 %v781_v30, %v749_v42  ;;  %v798_v63 = vmul.f32 %v782_v31, %v750_v43  ;;  %v795_v38 = vmax.f32 %v779_v32, 0.0  ;;  %v799_v1 = vmul.f32 %v783_v35, %v751_v11 }
  0xb9   : > { %v800_v39 = vmul.f32 %v784_v52, %v752_v57  ;;  %v801_v40 = vmul.f32 %v785_v53, %v753_v4  ;;  %v802_v2 = vmul.f32 %v786_v16, %v754_v54  ;;  %v803_v10 = vmul.f32 %v787_v61, %v755_v47 }
  0xba   : > { %v804_v41 = vmul.f32 %v788_v13, %v756_v5  ;;  %v805_v56 = vmul.f32 %v789_v18, %v757_v12  ;;  %v806_v44 = vmul.f32 %v790_v36, %v758_v58  ;;  %v807_v45 = vmul.f32 %v791_v62, %v759_v34 }
  0xbb   : > { %v808_v48 = vmul.f32 %v792_v37, %v760_v8  ;;  %v809_v49 = vmul.f32 %v793_v9, %v761_v33  ;;  %v810_v50 = vmul.f32 %v794_v19, %v762_v20  ;;  %v812_v51 = vmul.f32 0.16666667, %v796_v55 }
  0xbc   : > { %v813_v42 = vmul.f32 0.16666667, %v797_v17  ;;  %v814_v43 = vmul.f32 0.16666667, %v798_v63  ;;  %v811_v46 = vmul.f32 %v795_v38, %v763_v22  ;;  %v815_v11 = vmul.f32 0.16666667, %v799_v1 }
  0xbd   : > { %v816_v57 = vmul.f32 0.16666667, %v800_v39  ;;  %v817_v4 = vmul.f32 0.16666667, %v801_v40  ;;  %v818_v54 = vmul.f32 0.16666667, %v802_v2  ;;  %828 = vst [vmem:[%s1471_s11] sm:$0xff] %v812_v51 }
  0xbe   : > { %v819_v47 = vmul.f32 0.16666667, %v803_v10  ;;  %v820_v5 = vmul.f32 0.16666667, %v804_v41  ;;  %829 = vst [vmem:[%s1471_s11 + $0x8] sm:$0xff] %v813_v42  ;;  %830 = vst [vmem:[%s1471_s11 + $0x10] sm:$0xff] %v814_v43 }
  0xbf   : > { %v821_v12 = vmul.f32 0.16666667, %v805_v56  ;;  %v822_v58 = vmul.f32 0.16666667, %v806_v44  ;;  %v823_v34 = vmul.f32 0.16666667, %v807_v45 }
  0xc0   : > { %831 = vst [vmem:[%s1471_s11 + $0x18] sm:$0xff] %v815_v11  ;;  %832 = vst [vmem:[%s1471_s11 + $0x20] sm:$0xff] %v816_v57  ;;  %v824_v8 = vmul.f32 0.16666667, %v808_v48  ;;  %v825_v33 = vmul.f32 0.16666667, %v809_v49 }
  0xc1   : > { %833 = vst [vmem:[%s1471_s11 + $0x28] sm:$0xff] %v817_v4  ;;  %v826_v20 = vmul.f32 0.16666667, %v810_v50  ;;  %834 = vst [vmem:[%s1471_s11 + $0x30] sm:$0xff] %v818_v54  ;;  %v827_v7 = vmul.f32 0.16666667, %v811_v46 }
  0xc2   : > { %835 = vst [vmem:[%s1471_s11 + $0x38] sm:$0xff] %v819_v47  ;;  %836 = vst [vmem:[%s1471_s11 + $0x40] sm:$0xff] %v820_v5 }
  0xc3   : > { %837 = vst [vmem:[%s1471_s11 + $0x48] sm:$0xff] %v821_v12  ;;  %838 = vst [vmem:[%s1471_s11 + $0x50] sm:$0xff] %v822_v58 }
  0xc4   : > { %839 = vst [vmem:[%s1471_s11 + $0x58] sm:$0xff] %v823_v34  ;;  %840 = vst [vmem:[%s1471_s11 + $0x60] sm:$0xff] %v824_v8 }
  0xc5   : > { %841 = vst [vmem:[%s1471_s11 + $0x68] sm:$0xff] %v825_v33  ;;  %842 = vst [vmem:[%s1471_s11 + $0x70] sm:$0xff] %v826_v20 }
  0xc6   : > { %843 = vst [vmem:[%s1471_s11 + $0x78] sm:$0xff] %v827_v7 }
  0xc7   : > { %1027 = shalt.err (!%p1024_p5)
}
  0xc8   : > { %s1028_s30 = scalar_lea.hbm %s1491_s23, 2048  ;;  %s1032_s6 = scalar_lea.hbm %s1549_s3, 4096 }
  0xc9   : > { %p1029_p6 = scmp.ne.s32.totalorder %s1491_s23, %s1028_s30  ;;  %p1033_p10 = scmp.lt.u32.totalorder %s1491_s23, %s1549_s3 }
  0xca   : > { %p1034_p11 = scmp.lt.u32.totalorder %s1032_s6, %s1028_s30  ;;  %p1036_p13 = scmp.lt.u32.totalorder %s1028_s30, %s1491_s23 }
  0xcb   : > { %p1030_p7 = pnand %p1029_p6, %p1158_p4 }
  0xcc   : > { %p1035_p12 = por %p1034_p11, %p1033_p10 }
  0xcd   : > { %p1031_p9 = pneg %p1030_p7 }
  0xce   : > { %p1037_p0 = por %p1036_p13, %p1035_p12 }
  0xd0   : > { %p1038_p1 = pnand %p1037_p0, %p1031_p9 }
  0xd2   : > { %1041 = shalt.err (!%p1038_p1)
}
  0xd3   : > { %951 = dma.vmem_to_hbm [thread:$0]  (%p1158_p4), %s1495_s18, 2048, %s1491_s23, %s845_s26  }
  0xd4 PF: > { %p957_p2 = scmp.ge.s32.totalorder %s1092_s17, 2  ;;  %s873_s9 = sand.u32 1, %s1072_s12  }
  0xd5   : > { %s874_s10 = scalar_lea.sflag [#allocation3], %s873_s9 }
  0xd6   : > { %p954_p3 = pnand %p957_p2, %p1165_p8 }
  0xd8   : > { %1067 = dma.done.wait (!%p954_p3), %s874_s10, 2048  }
  0xd9   : > { %1069 = vsyncadd (!%p954_p3), %s874_s10, 4294965248  ;;  %s16_s17 = sadd.s32 1, %s1092_s17   ;;  %s1560_s12 = smov %s1076_s13 }
  0xda   : > { %p13_p5 = scmp.ge.s32.totalorder %s16_s17, 4   ;;  %s1561_s13 = smov %s1080_s14 }
  0xdb   : > { %s1562_s14 = smov %s1171_s25  ;;  %s1563_s15 = smov %s1088_s16 }
  0xdc   : > { %s1564_s16 = smov %s1566_s20  ;;  %15 = sbr.rel (!%p13_p5) target bundleno = 4 (0x4), region = 67 }
  0xe3   :  { %879 = vsyncpa [#allocation3], 1 }
  0xe4   :  { %881 = vsyncpa [#allocation3 + $0x1], 1 }

</bundles_post_ra>
